<compile_context>
chip_gen: v7x
topology: tpu7x:2x2x1
jax: 0.10.0
libtpu: 0.0.40
codegen_flags: <defaults>
</compile_context>

<pallas_src>
import jax
import jax.numpy as jnp
from jax import lax
from jax.experimental import pallas as pl
from jax.experimental.pallas import tpu as pltpu


# uint32 hash constants expressed as (wrapped) int32 literals.
_GOLDEN = 0x9E3779B9 - (1 << 32)   # -1640531527
_MIX1 = 0x7FEB352D                 #  2145916205
_MIX2 = 0x846CA68B - (1 << 32)     # -2073581941


def _lsr(x, k):
    """Logical right shift on int32: arithmetic shift + mask of sign-extension."""
    return (x >> k) & jnp.int32((1 << (32 - k)) - 1)


def _splitmix32(x):
    """SplitMix32-style avalanche on int32 (wrapping multiplies, logical shifts)."""
    x = x ^ _lsr(x, 16)
    x = x * jnp.int32(_MIX1)
    x = x ^ _lsr(x, 15)
    x = x * jnp.int32(_MIX2)
    x = x ^ _lsr(x, 16)
    return x


def _keep_mask(rows, cols, n_cols, seed, dtype):
    """Bernoulli(0.5) keep mask from a counter-based hash.

    The counter is the *global* flat element index, so different batch tiles
    (and the pure-JAX reference) see the same stream; the seed is separated
    by a golden-ratio multiple before the avalanche, so adjacent seeds do not
    collide for realistic element counts.
    """
    ctr = rows * jnp.int32(n_cols) + cols
    h = _splitmix32(ctr + seed * jnp.int32(_GOLDEN))
    return _lsr(h, 31).astype(dtype)   # top bit -> {0, 1}


def _eval_kernel(x_ref, wt_ref, b_ref, mean_ref):
    """Eval path: mean = fc(x).  (nn.Dropout is the identity in eval mode.)"""
    y = jnp.dot(x_ref[...], wt_ref[...], preferred_element_type=jnp.float32)
    mean_ref[...] = (y + b_ref[...]).astype(mean_ref.dtype)


def _train_kernel(seed_ref, x_ref, wt_ref, b_ref, y_ref):
    """Training path: fc(dropout(x)) with p=0.5 inverted dropout."""
    tb, f = x_ref.shape
    row0 = pl.program_id(0) * tb
    rows = lax.broadcasted_iota(jnp.int32, (tb, f), 0) + row0
    cols = lax.broadcasted_iota(jnp.int32, (tb, f), 1)
    keep = _keep_mask(rows, cols, f, seed_ref[0], x_ref.dtype)
    y = jnp.dot(x_ref[...] * keep, wt_ref[...], preferred_element_type=jnp.float32)
    # Fold the 1/(1-p)=2 scale into the (TB, C_pad) output, not the (TB, F) input.
    y_ref[...] = (2.0 * y + b_ref[...]).astype(y_ref.dtype)


def _round_up(n, m):
    return ((n + m - 1) // m) * m


class UncertaintyHeadPallas:
    """Pallas port of UncertaintyHead(in_features, num_classes)."""

    def __init__(self, in_features, num_classes, key, batch_tile=128):
        # batch_tile=128 saturates the v5e MXU M dim; use 256 on v6e / v7x.
        self.in_features = in_features
        self.num_classes = num_classes
        self.batch_tile = batch_tile
        self.c_pad = _round_up(num_classes, 128)   # lane-dense output dim

        # Deterministic init mirroring nn.Linear: U(-k, k), k = 1/sqrt(fan_in).
        k_w, k_b = jax.random.split(key)
        bound = 1.0 / (in_features ** 0.5)
        w = jax.random.uniform(k_w, (num_classes, in_features),
                               minval=-bound, maxval=bound, dtype=jnp.float32)
        b = jax.random.uniform(k_b, (num_classes,),
                               minval=-bound, maxval=bound, dtype=jnp.float32)
        self.w_t = jnp.transpose(w)                      # [F, C]  (for reference)
        self.b = b                                       # [C]
        # Zero-padded, lane-dense parameters used by the kernels.
        self.w_t_pad = jnp.zeros((in_features, self.c_pad), jnp.float32
                                 ).at[:, :num_classes].set(self.w_t)
        self.b_pad = jnp.zeros((1, self.c_pad), jnp.float32
                               ).at[:, :num_classes].set(b[None, :])

    # ------------------------------------------------------------------ API
    def __call__(self, x, num_samples=10, training=False, seed=0):
        if training:
            # Matches PyTorch: training forward ignores num_samples and
            # returns a single stochastic fc(dropout(x)).
            return self._train_forward(x, seed)
        # Eval: dropout is identity, so all `num_samples` (>= 2) MC samples
        # equal fc(x) -> mean == fc(x) and the unbiased variance is 0.
        mean = self._eval_forward(x)
        return mean, jnp.zeros_like(mean)

    # ------------------------------------------------------------ internals
    def _tiles(self, batch):
        tb = min(self.batch_tile, _round_up(batch, 8))
        b_pad = _round_up(batch, tb)
        return tb, b_pad

    def _eval_forward(self, x):
        B, F = x.shape
        assert F == self.in_features
        tb, b_pad = self._tiles(B)
        xp = x if b_pad == B else jnp.pad(x, ((0, b_pad - B), (0, 0)))
        out = pl.pallas_call(
            _eval_kernel,
            out_shape=jax.ShapeDtypeStruct((b_pad, self.c_pad), x.dtype),
            grid_spec=pltpu.PrefetchScalarGridSpec(
                num_scalar_prefetch=0,
                grid=(b_pad // tb,),
                in_specs=[pl.BlockSpec((tb, F), lambda i: (i, 0)),
                          pl.BlockSpec((F, self.c_pad), lambda i: (0, 0)),
                          pl.BlockSpec((1, self.c_pad), lambda i: (0, 0))],
                out_specs=pl.BlockSpec((tb, self.c_pad), lambda i: (i, 0))),
            compiler_params=pltpu.CompilerParams(
                dimension_semantics=("parallel",)),
        )(xp, self.w_t_pad, self.b_pad)
        return out[:B, :self.num_classes]

    def _train_forward(self, x, seed):
        B, F = x.shape
        assert F == self.in_features
        tb, b_pad = self._tiles(B)
        xp = x if b_pad == B else jnp.pad(x, ((0, b_pad - B), (0, 0)))
        seed_arr = jnp.asarray([seed], dtype=jnp.int32)
        out = pl.pallas_call(
            _train_kernel,
            out_shape=jax.ShapeDtypeStruct((b_pad, self.c_pad), x.dtype),
            grid_spec=pltpu.PrefetchScalarGridSpec(
                num_scalar_prefetch=1,
                grid=(b_pad // tb,),
                in_specs=[pl.BlockSpec((tb, F), lambda i, s: (i, 0)),
                          pl.BlockSpec((F, self.c_pad), lambda i, s: (0, 0)),
                          pl.BlockSpec((1, self.c_pad), lambda i, s: (0, 0))],
                out_specs=pl.BlockSpec((tb, self.c_pad), lambda i, s: (i, 0))),
            compiler_params=pltpu.CompilerParams(
                dimension_semantics=("parallel",)),   # tiles independent (global-counter RNG)
        )(seed_arr, xp, self.w_t_pad, self.b_pad)
        return out[:B, :self.num_classes]


if __name__ == "__main__":
    key = jax.random.PRNGKey(0)
    k_param, k_x = jax.random.split(key)

    B, F, C = 8, 32, 8          # batch, in_features, num_classes
    head = UncertaintyHeadPallas(F, C, k_param)
    x = jax.random.normal(k_x, (B, F), dtype=jnp.float32)

    # Inference path: (mean, variance).
    mean, var = head(x, num_samples=10, training=False)
    jax.block_until_ready((mean, var))
    assert mean.shape == (B, C) and var.shape == (B, C)

    ref_mean = x @ head.w_t + head.b[None, :]
    assert jnp.allclose(mean, ref_mean, atol=1e-3, rtol=1e-3)
    assert jnp.allclose(var, 0.0)

    # Training path: single stochastic fc(dropout(x)).
    # TODO(synk): PyTorch's dropout RNG stream cannot be matched bit-exactly;
    # the mask is a deterministic counter-based SplitMix32 hash instead.
    seed = 0
    y_train = head(x, training=True, seed=seed)
    jax.block_until_ready(y_train)
    assert y_train.shape == (B, C)

    # Cross-check the training kernel against a pure-JAX replay of the same mask.
    rows = lax.broadcasted_iota(jnp.int32, (B, F), 0)
    cols = lax.broadcasted_iota(jnp.int32, (B, F), 1)
    keep = _keep_mask(rows, cols, F, jnp.int32(seed), x.dtype)
    ref_train = 2.0 * ((x * keep) @ head.w_t) + head.b[None, :]
    assert jnp.allclose(y_train, ref_train, atol=1e-3, rtol=1e-3)

    print("KERNEL_OK")
</pallas_src>

<mosaic_0001>
module attributes {stable_mosaic.version = 11 : i64} {
  func.func @_eval_kernel(%arg0: i32, %arg1: memref<8x32xf32, #tpu.memory_space<vmem>>, %arg2: memref<32x128xf32, #tpu.memory_space<vmem>>, %arg3: memref<1x128xf32, #tpu.memory_space<vmem>>, %arg4: memref<8x128xf32, #tpu.memory_space<vmem>>) attributes {dimension_semantics = [#tpu.dimension_semantics<parallel>], iteration_bounds = array<i64: 1>, scalar_prefetch = 0 : i64, scratch_operands = 0 : i64, tpu.core_type = #tpu.core_type<tc>, window_params = [{transform_indices = @transform_0, window_bounds = array<i64: 8, 32>}, {pipeline_mode = #tpu.pipeline_mode<synchronous>, transform_indices = @transform_1, window_bounds = array<i64: 32, 128>}, {pipeline_mode = #tpu.pipeline_mode<synchronous>, transform_indices = @transform_2, window_bounds = array<i64: 1, 128>}, {transform_indices = @transform_3, window_bounds = array<i64: 8, 128>}]} {
    %c0 = arith.constant 0 : index
    %c0_0 = arith.constant 0 : index
    %0 = vector.load %arg1[%c0, %c0_0] : memref<8x32xf32, #tpu.memory_space<vmem>>, vector<8x32xf32>
    %c0_1 = arith.constant 0 : index
    %c0_2 = arith.constant 0 : index
    %1 = vector.load %arg2[%c0_1, %c0_2] : memref<32x128xf32, #tpu.memory_space<vmem>>, vector<32x128xf32>
    %cst = arith.constant dense<0.000000e+00> : vector<8x128xf32>
    %2 = tpu.matmul %0, %1, %cst {dimension_numbers = #tpu.dot_dimension_numbers<[1], [0], [0], [1], [0, 0, 1, 1], [], []>} : vector<8x32xf32>, vector<32x128xf32>, vector<8x128xf32> -> vector<8x128xf32>
    %c0_3 = arith.constant 0 : index
    %c0_4 = arith.constant 0 : index
    %3 = vector.load %arg3[%c0_3, %c0_4] : memref<1x128xf32, #tpu.memory_space<vmem>>, vector<1x128xf32>
    %4 = vector.broadcast %3 : vector<1x128xf32> to vector<8x128xf32>
    %5 = arith.addf %2, %4 : vector<8x128xf32>
    %c0_5 = arith.constant 0 : index
    %c0_6 = arith.constant 0 : index
    %6 = vector.load %arg4[%c0_5, %c0_6] : memref<8x128xf32, #tpu.memory_space<vmem>>, vector<8x128xf32>
    tpu.vector_store %arg4[%c0_5, %c0_6], %5 {strides = array<i32>} : memref<8x128xf32, #tpu.memory_space<vmem>>, vector<8x128xf32>,
    return
  }
  func.func @transform_0(%arg0: i32) -> (i32, i32) {
    %c0_i32 = arith.constant 0 : i32
    %c0_i32_0 = arith.constant 0 : i32
    return %arg0, %c0_i32 : i32, i32
  }
  func.func @transform_1(%arg0: i32) -> (i32, i32) {
    %c0_i32 = arith.constant 0 : i32
    %c0_i32_0 = arith.constant 0 : i32
    %c0_i32_1 = arith.constant 0 : i32
    return %c0_i32, %c0_i32_0 : i32, i32
  }
  func.func @transform_2(%arg0: i32) -> (i32, i32) {
    %c0_i32 = arith.constant 0 : i32
    %c0_i32_0 = arith.constant 0 : i32
    %c0_i32_1 = arith.constant 0 : i32
    return %c0_i32, %c0_i32_0 : i32, i32
  }
  func.func @transform_3(%arg0: i32) -> (i32, i32) {
    %c0_i32 = arith.constant 0 : i32
    %c0_i32_0 = arith.constant 0 : i32
    return %arg0, %c0_i32 : i32, i32
  }
}

</mosaic_0001>

<bundles_post_ra>
// kernel: tpu_custom_call.1
= control target key start
LH: loop header
LB: loop body
LE: loop exit
PB: predicated region body
PF: predicated region fallthrough
CT: control target
= control target key end

     0   :  { %8 = vsyncpa [#allocation3], 0  ;;  %s322_s0 = inlined_call_operand.hbm [shape: f32[8,32], index: 0, kind: input, shape index: {}]   ;;  %s323_s1 = inlined_call_operand.hbm [shape: f32[32,128], index: 1, kind: input, shape index: {}]   ;;  %s324_s2 = inlined_call_operand.vmem [shape: f32[1,128], index: 2, kind: input, shape index: {}]   ;;  %s325_s3 = inlined_call_operand.hbm [shape: f32[8,128], index: 3, kind: output, shape index: {}]  }
   0x1   :  { %9 = vsyncpa [#allocation6], 0 }
   0x2   :  { %10 = vsyncpa [#allocation4], 0  ;;  %s248_s12 = smov [#allocation2]   ;;  %s249_s14 = smov [#allocation5]  }
   0x3   :  { %s17_s13 = sshll.u32 %s248_s12, 4  ;;  %s26_s15 = sshll.u32 %s249_s14, 4  ;;  %s18_s13 = int_to_ptr.vmem [resolvable:$true] %s17_s13  ;;  %s276_s15 = int_to_ptr.vmem [resolvable:$true] %s26_s15 }
   0x4   :  { %s176_s18 = scalar_lea.hbm %s322_s0, 128 }
   0x5   :  { %p177_p0 = scmp.ne.s32.totalorder %s322_s0, %s176_s18  ;;  %p180_p1 = scmp.lt.u32.totalorder %s176_s18, %s322_s0 }
   0x7   :  { %p182_p2 = pnand %p180_p1, %p177_p0 }
   0x9   :  { %185 = shalt.err (!%p182_p2)
}
   0xa   :  { %s186_s23 = scalar_lea.vmem %s18_s13, 128  ;;  %p191_p4 = scmp.lt.s32.totalorder %s18_s13, %s18_s13 }
   0xb   :  { %p187_p3 = scmp.ne.s32.totalorder %s18_s13, %s186_s23  ;;  %p192_p5 = scmp.lt.s32.totalorder %s186_s23, %s186_s23 }
   0xd   :  { %p193_p6 = por %p192_p5, %p191_p4 }
   0xf   :  { %p194_p7 = pnand %p193_p6, %p187_p3 }
  0x11   :  { %197 = shalt.err (!%p194_p7)
}
  0x12   :  { %20 = dma.hbm_to_vmem [thread:$0]  %s322_s0, 128, %s18_s13, [#allocation3]  }
  0x13   :  { %s198_s28 = scalar_lea.hbm %s323_s1, 512 }
  0x14   :  { %p199_p8 = scmp.ne.s32.totalorder %s323_s1, %s198_s28  ;;  %p202_p9 = scmp.lt.u32.totalorder %s198_s28, %s323_s1 }
  0x16   :  { %p204_p10 = pnand %p202_p9, %p199_p8 }
  0x18   :  { %207 = shalt.err (!%p204_p10)
}
  0x19   :  { %s208_s6 = scalar_lea.vmem %s276_s15, 512  ;;  %p213_p12 = scmp.lt.s32.totalorder %s276_s15, %s276_s15 }
  0x1a   :  { %p209_p11 = scmp.ne.s32.totalorder %s276_s15, %s208_s6  ;;  %p214_p13 = scmp.lt.s32.totalorder %s208_s6, %s208_s6 }
  0x1c   :  { %p215_p0 = por %p214_p13, %p213_p12 }
  0x1e   :  { %p216_p1 = pnand %p215_p0, %p209_p11 }
  0x20   :  { %219 = shalt.err (!%p216_p1)
}
  0x21   :  { %s250_s0 = smov 128   ;;  %s251_s7 = smov 8  }
  0x22   :  { %32 = dma.hbm_to_vmem [thread:$0]  %s323_s1, 512, %s276_s15, [#allocation6], %s250_s0, %s250_s0, %s251_s7  }
  0x23   :  { %242 = dma.done.wait [#allocation3], 128  }
  0x24   :  { %243 = vsyncadd [#allocation3], 4294967168 }
  0x25   :  { %244 = dma.done.wait [#allocation6], 512  }
  0x26   :  { %245 = vsyncadd [#allocation6], 4294966784  ;;  %v252_v0 = vmov 0.0|0.0   ;;  %vm253_vm0 = vmmov 0   ;;  %v254_v1 = vmov 0.0   ;;  %v42_v2 = vld [vmem:[#allocation5] sm:$0xff] }
  0x27   :  { %162 = vmatprep.subr.bf16.mxu0 %v252_v0  ;;  %159 = vmatprep.mubr.msk.f32.mxu0 %vm253_vm0, %v254_v1  ;;  %v43_v3 = vld [vmem:[#allocation5 + $0x8] sm:$0xff]  ;;  %v44_v4 = vld [vmem:[#allocation5 + $0x10] sm:$0xff]  ;;  %v45_v6 = vld [vmem:[#allocation5 + $0x18] sm:$0xff]  ;;  %vm53_vm1 = vcmask 261120   ;;  %s255_s11 = smov [#allocation7]  }
  0x28   :  { %v163_v5 = vpack.c.bf16 %v43_v3, %v42_v2  ;;  %v166_v7 = vpack.c.bf16 %v45_v6, %v44_v4  ;;  %v41_v8 = vld [vmem:[#allocation2] sm:$0xff]  ;;  %s134_s12 = sshll.u32 %s255_s11, 4  ;;  %s135_s12 = int_to_ptr.vmem [resolvable:$true] %s134_s12 }
  0x29   :  { %v144_v9 = vld [vmem:[%s324_s2] ss:$0 sm:$0xff]  ;;  %s220_s13 = scalar_lea.vmem %s135_s12, 128  ;;  %p225_p3 = scmp.lt.s32.totalorder %s135_s12, %s135_s12 }
  0x2a   :  { %164 = vmatpush3.bf16.msra.mxu0 %v163_v5  ;;  %p221_p2 = scmp.ne.s32.totalorder %s135_s12, %s220_s13  ;;  %p226_p4 = scmp.lt.s32.totalorder %s220_s13, %s220_s13 }
  0x2b   :  { %165 = vmatprep.subr.bf16.mxu0 %v252_v0 }
  0x2c   :  { %p227_p5 = por %p226_p4, %p225_p3 }
  0x2e   :  { %167 = vmatpush3.bf16.msra.mxu0 %v166_v7  ;;  %p228_p6 = pnand %p227_p5, %p221_p2 }
  0x31   :  { %160 = vmatmul.mubr.msk.f32.vlgmr.msra.gmra.mrb[0].mxu0 %vm53_vm1, %v41_v8 }
 0x104   :  { %v123_v10 = vpop.f32.mrb[0].mxu0 }
 0x105   :  { %v124_v11 = vadd.f32 %v144_v9, %v123_v10  ;;  %v161_v12 = vpop.f32.mrb[1].mxu0 }
 0x107   :  { %127 = vst [vmem:[#allocation7] sm:$0xff] %v124_v11 }
 0x108   :  { %231 = shalt.err (!%p228_p6)
}
 0x109   :  { %s232_s16 = scalar_lea.hbm %s325_s3, 128 }
 0x10a   :  { %p233_p7 = scmp.ne.s32.totalorder %s325_s3, %s232_s16  ;;  %p236_p8 = scmp.lt.u32.totalorder %s232_s16, %s325_s3 }
 0x10c   :  { %p238_p9 = pnand %p236_p8, %p233_p7 }
 0x10e   :  { %241 = shalt.err (!%p238_p9)
}
 0x10f   :  { %137 = dma.vmem_to_hbm [thread:$0]  %s135_s12, 128, %s325_s3, [#allocation4]  }
 0x110   :  { %246 = dma.done.wait [#allocation4], 128  }
 0x111   :  { %247 = vsyncadd [#allocation4], 4294967168 }
 0x112   :  { %141 = vsyncpa [#allocation3], 1 }
 0x113   :  { %142 = vsyncpa [#allocation6], 1 }
 0x114   :  { %143 = vsyncpa [#allocation4], 1 }

</bundles_post_ra>
